<compile_context>
chip_gen: v7x
topology: tpu7x:2x2x1
jax: 0.10.0
libtpu: 0.0.40
codegen_flags: <defaults>
</compile_context>

<pallas_src>
import jax
import jax.numpy as jnp
from jax.experimental import pallas as pl
from jax.experimental.pallas import tpu as pltpu


def _round_up(a: int, b: int) -> int:
    return ((a + b - 1) // b) * b


def _linear_kernel(x_ref, w_ref, b_ref, o_ref):
    # y = x * w + b  (== x @ W^T + b for a 1x1 weight) — single VPU FMA per tile.
    # w_ref / b_ref are (1, 1) SMEM scalars, broadcast against the VMEM tile.
    o_ref[...] = x_ref[...] * w_ref[0, 0] + b_ref[0, 0]


def _linear_forward_pallas(x, weight, bias, *, lane, max_rows_per_block):
    """x: (N, 1) f32, weight: (1, 1) f32, bias: (1,) f32 -> (N, 1) f32."""
    n = x.shape[0]

    # ---- Lane-dense layout: (N, 1) -> (rows_padded, lane), lane % 128 == 0 ----
    rows = pl.cdiv(n, lane)
    # Row-tile: multiple of 8 (sublane granularity), capped so each block
    # stays ~<= 2 MiB f32 => double-buffered in+out ~8 MiB, safe even for
    # v7x's smaller scoped VMEM.
    tr = min(max_rows_per_block, _round_up(rows, 8))
    rows_padded = _round_up(rows, tr)

    total = rows_padded * lane
    flat = x.reshape(-1)
    pad = total - n
    if pad:
        flat = jnp.pad(flat, (0, pad))
    slab = flat.reshape(rows_padded, lane)

    w2d = weight.reshape(1, 1)
    b2d = bias.reshape(1, 1)

    grid = (rows_padded // tr,)

    out = pl.pallas_call(
        _linear_kernel,
        out_shape=jax.ShapeDtypeStruct((rows_padded, lane), x.dtype),
        grid_spec=pl.GridSpec(
            grid=grid,
            in_specs=[
                # x: tiled along rows, full lane width -> unmasked full vst.
                pl.BlockSpec((tr, lane), lambda i: (i, 0)),
                # weight / bias: loaded once into SMEM, reused every grid step.
                pl.BlockSpec(memory_space=pltpu.MemorySpace.SMEM),
                pl.BlockSpec(memory_space=pltpu.MemorySpace.SMEM),
            ],
            out_specs=pl.BlockSpec((tr, lane), lambda i: (i, 0)),
        ),
        compiler_params=pltpu.CompilerParams(
            # Each row-tile is independent -> shard across TCs on v7x.
            dimension_semantics=("parallel",),
        ),
    )(slab, w2d, b2d)

    return out.reshape(-1)[:n].reshape(n, 1)


def linear_forward(x, weight, bias, *, force_pallas=False,
                   lane=512, max_rows_per_block=1024):
    """Linear(1,1) forward: y = x @ W^T + b for x of shape (N, 1)."""
    n = x.shape[0]
    if not force_pallas and n < 1024:
        # Tiny batch: custom-call + DMA overhead dwarfs a handful of FMAs;
        # let XLA fuse the scalar multiply-add instead.
        return x * weight[0, 0] + bias[0]
    return _linear_forward_pallas(x, weight, bias,
                                  lane=lane,
                                  max_rows_per_block=max_rows_per_block)


if __name__ == "__main__":
    key = jax.random.PRNGKey(0)
    kx, kw, kb = jax.random.split(key, 3)

    # Deterministic parameters (shapes from nn.Linear(1, 1)).
    weight = jax.random.uniform(kw, (1, 1), jnp.float32, -1.0, 1.0)
    bias = jax.random.uniform(kb, (1,), jnp.float32, -1.0, 1.0)

    # Small demo batch, shape (8, 1) — matches forward(x) with x: (N, 1).
    x_small = jax.random.normal(kx, (8, 1), jnp.float32)
    y_small = linear_forward(x_small, weight, bias, force_pallas=True)
    jax.block_until_ready(y_small)
    ref_small = x_small @ weight.T + bias
    assert y_small.shape == (8, 1)
    assert jnp.allclose(y_small, ref_small, atol=1e-6), "mismatch vs reference (small)"

    # Slightly larger case with tiny tile params so the pipelined grid has
    # multiple steps (exercises tiling + "parallel" axis while staying small).
    x_big = jax.random.normal(kx, (4096, 1), jnp.float32)
    y_big = linear_forward(x_big, weight, bias, force_pallas=True,
                           lane=128, max_rows_per_block=8)
    jax.block_until_ready(y_big)
    ref_big = x_big @ weight.T + bias
    assert y_big.shape == (4096, 1)
    assert jnp.allclose(y_big, ref_big, atol=1e-6), "mismatch vs reference (big)"

    print("KERNEL_OK")
</pallas_src>

<mosaic_0001>
module attributes {stable_mosaic.version = 11 : i64} {
  func.func @_linear_kernel(%arg0: i32, %arg1: memref<8x512xf32, #tpu.memory_space<vmem>>, %arg2: memref<1x1xf32, #tpu.memory_space<smem>>, %arg3: memref<1x1xf32, #tpu.memory_space<smem>>, %arg4: memref<8x512xf32, #tpu.memory_space<vmem>>) attributes {dimension_semantics = [#tpu.dimension_semantics<parallel>], iteration_bounds = array<i64: 1>, scalar_prefetch = 0 : i64, scratch_operands = 0 : i64, tpu.core_type = #tpu.core_type<tc>, window_params = [{transform_indices = @transform_0, window_bounds = array<i64: 8, 512>}, {transform_indices = @transform_1, window_bounds = array<i64: 1, 1>}, {transform_indices = @transform_2, window_bounds = array<i64: 1, 1>}, {transform_indices = @transform_3, window_bounds = array<i64: 8, 512>}]} {
    %c0 = arith.constant 0 : index
    %c0_0 = arith.constant 0 : index
    %0 = vector.load %arg1[%c0, %c0_0] : memref<8x512xf32, #tpu.memory_space<vmem>>, vector<8x512xf32>
    %c0_1 = arith.constant 0 : index
    %c0_2 = arith.constant 0 : index
    %1 = memref.load %arg2[%c0_1, %c0_2] : memref<1x1xf32, #tpu.memory_space<smem>>
    %2 = vector.broadcast %1 : f32 to vector<8x512xf32>
    %3 = arith.mulf %0, %2 : vector<8x512xf32>
    %c0_3 = arith.constant 0 : index
    %c0_4 = arith.constant 0 : index
    %4 = memref.load %arg3[%c0_3, %c0_4] : memref<1x1xf32, #tpu.memory_space<smem>>
    %5 = vector.broadcast %4 : f32 to vector<8x512xf32>
    %6 = arith.addf %3, %5 : vector<8x512xf32>
    %c0_5 = arith.constant 0 : index
    %c0_6 = arith.constant 0 : index
    %7 = vector.load %arg4[%c0_5, %c0_6] : memref<8x512xf32, #tpu.memory_space<vmem>>, vector<8x512xf32>
    tpu.vector_store %arg4[%c0_5, %c0_6], %6 {strides = array<i32>} : memref<8x512xf32, #tpu.memory_space<vmem>>, vector<8x512xf32>,
    return
  }
  func.func @transform_0(%arg0: i32) -> (i32, i32) {
    %c0_i32 = arith.constant 0 : i32
    %c0_i32_0 = arith.constant 0 : i32
    return %arg0, %c0_i32 : i32, i32
  }
  func.func @transform_1(%arg0: i32) -> (i32, i32) {
    %c0_i32 = arith.constant 0 : i32
    %c0_i32_0 = arith.constant 0 : i32
    %c0_i32_1 = arith.constant 0 : i32
    return %c0_i32, %c0_i32_0 : i32, i32
  }
  func.func @transform_2(%arg0: i32) -> (i32, i32) {
    %c0_i32 = arith.constant 0 : i32
    %c0_i32_0 = arith.constant 0 : i32
    %c0_i32_1 = arith.constant 0 : i32
    return %c0_i32, %c0_i32_0 : i32, i32
  }
  func.func @transform_3(%arg0: i32) -> (i32, i32) {
    %c0_i32 = arith.constant 0 : i32
    %c0_i32_0 = arith.constant 0 : i32
    return %arg0, %c0_i32 : i32, i32
  }
}

</mosaic_0001>

<bundles_post_ra>
// kernel: tpu_custom_call.1
= control target key start
LH: loop header
LB: loop body
LE: loop exit
PB: predicated region body
PF: predicated region fallthrough
CT: control target
= control target key end

     0   :  { %10 = vsyncpa [#allocation5], 0  ;;  %s166_s0 = inlined_call_operand.hbm [shape: f32[8,512], index: 0, kind: input, shape index: {}]   ;;  %s167_s1 = inlined_call_operand.<no memory space> [shape: f32[1,1], index: 1, kind: input, shape index: {}]   ;;  %s168_s2 = inlined_call_operand.<no memory space> [shape: f32[1,1], index: 2, kind: input, shape index: {}]   ;;  %s169_s3 = inlined_call_operand.hbm [shape: f32[8,512], index: 3, kind: output, shape index: {}]  }
   0x1   :  { %11 = vsyncpa [#allocation6], 0  ;;  %s114_s12 = smov [#allocation4]   ;;  %s66_s16 = scalar_lea.hbm %s166_s0, 512 }
   0x2   :  { %s18_s13 = sshll.u32 %s114_s12, 4  ;;  %p67_p0 = scmp.ne.s32.totalorder %s166_s0, %s66_s16  ;;  %s19_s13 = int_to_ptr.vmem [resolvable:$true] %s18_s13 }
   0x3   :  { %p70_p1 = scmp.lt.u32.totalorder %s66_s16, %s166_s0 }
   0x5   :  { %p72_p2 = pnand %p70_p1, %p67_p0 }
   0x7   :  { %75 = shalt.err (!%p72_p2)
}
   0x8   :  { %s76_s21 = scalar_lea.vmem %s19_s13, 512  ;;  %p81_p4 = scmp.lt.s32.totalorder %s19_s13, %s19_s13 }
   0x9   :  { %p77_p3 = scmp.ne.s32.totalorder %s19_s13, %s76_s21  ;;  %p82_p5 = scmp.lt.s32.totalorder %s76_s21, %s76_s21 }
   0xb   :  { %p83_p6 = por %p82_p5, %p81_p4 }
   0xd   :  { %p84_p7 = pnand %p83_p6, %p77_p3 }
   0xf   :  { %87 = shalt.err (!%p84_p7)
}
  0x10   :  { %21 = dma.hbm_to_vmem [thread:$0]  %s166_s0, 512, %s19_s13, [#allocation5]  }
  0x11   :  { %110 = dma.done.wait [#allocation5], 512  }
  0x12   :  { %111 = vsyncadd [#allocation5], 4294966784  ;;  %v34_v0 = vstv %s167_s1  ;;  %v29_v1 = vld [vmem:[#allocation4] sm:$0xff]  ;;  %v40_v2 = vstv %s168_s2  ;;  %v30_v3 = vld [vmem:[#allocation4 + $0x8] sm:$0xff]  ;;  %s115_s28 = smov [#allocation7]  }
  0x13   :  { %v31_v4 = vld [vmem:[#allocation4 + $0x10] sm:$0xff]  ;;  %v35_v5 = vmul.f32 %v34_v0, %v29_v1  ;;  %v36_v6 = vmul.f32 %v34_v0, %v30_v3  ;;  %v32_v8 = vld [vmem:[#allocation4 + $0x18] sm:$0xff]  ;;  %s55_s29 = sshll.u32 %s115_s28, 4  ;;  %s56_s29 = int_to_ptr.vmem [resolvable:$true] %s55_s29 }
  0x14   :  { %v37_v7 = vmul.f32 %v34_v0, %v31_v4  ;;  %v38_v9 = vmul.f32 %v34_v0, %v32_v8  ;;  %s88_s0 = scalar_lea.vmem %s56_s29, 512  ;;  %p93_p9 = scmp.lt.s32.totalorder %s56_s29, %s56_s29 }
  0x15   :  { %v41_v10 = vadd.f32 %v40_v2, %v35_v5  ;;  %v42_v11 = vadd.f32 %v40_v2, %v36_v6  ;;  %p89_p8 = scmp.ne.s32.totalorder %s56_s29, %s88_s0  ;;  %p94_p10 = scmp.lt.s32.totalorder %s88_s0, %s88_s0 }
  0x16   :  { %v43_v12 = vadd.f32 %v40_v2, %v37_v7  ;;  %v44_v13 = vadd.f32 %v40_v2, %v38_v9 }
  0x17   :  { %45 = vst [vmem:[#allocation7] sm:$0xff] %v41_v10  ;;  %46 = vst [vmem:[#allocation7 + $0x8] sm:$0xff] %v42_v11  ;;  %p95_p11 = por %p94_p10, %p93_p9 }
  0x18   :  { %47 = vst [vmem:[#allocation7 + $0x10] sm:$0xff] %v43_v12  ;;  %48 = vst [vmem:[#allocation7 + $0x18] sm:$0xff] %v44_v13 }
  0x19   :  { %p96_p12 = pnand %p95_p11, %p89_p8 }
  0x1b   :  { %99 = shalt.err (!%p96_p12)
}
  0x1c   :  { %s100_s30 = scalar_lea.hbm %s169_s3, 512 }
  0x1d   :  { %p101_p13 = scmp.ne.s32.totalorder %s169_s3, %s100_s30  ;;  %p104_p0 = scmp.lt.u32.totalorder %s100_s30, %s169_s3 }
  0x1f   :  { %p106_p1 = pnand %p104_p0, %p101_p13 }
  0x21   :  { %109 = shalt.err (!%p106_p1)
}
  0x22   :  { %58 = dma.vmem_to_hbm [thread:$0]  %s56_s29, 512, %s169_s3, [#allocation6]  }
  0x23   :  { %112 = dma.done.wait [#allocation6], 512  }
  0x24   :  { %113 = vsyncadd [#allocation6], 4294966784 }
  0x25   :  { %62 = vsyncpa [#allocation5], 1 }
  0x26   :  { %63 = vsyncpa [#allocation6], 1 }

</bundles_post_ra>
